<compile_context>
chip_gen: v7x
topology: tpu7x:2x2x1
jax: 0.10.0
libtpu: 0.0.40
codegen_flags: <defaults>
</compile_context>

<pallas_src>
import functools

import jax
import jax.numpy as jnp
from jax.experimental import pallas as pl
from jax.experimental.pallas import tpu as pltpu


def _round_up(n, m):
    return (n + m - 1) // m * m


def _layer_dims(input_shape, n_latent):
    # (out, in) per layer, PyTorch nn.Linear layout: fc1..fc6.
    return ((8, input_shape), (8, 8), (n_latent, 8),
            (8, n_latent), (8, 8), (input_shape, 8))


def _row_offsets(dims):
    offs, r = [], 0
    for out_d, _ in dims:
        offs.append(r)
        r += _round_up(out_d, 8)          # keep every layer's row block 8-aligned
    return offs, r


def pack_params(params, input_shape, n_latent):
    """Pack all six (W [out,in], b [out]) pairs into one lane-padded f32 slab.

    Each layer occupies an 8-aligned row block laid out as [ W | b | 0-pad ],
    i.e. slab[r0:r0+out, :in] = W and slab[r0:r0+out, in] = b.  One slab means
    a single DMA instead of 13 tiny ones; static slices inside the kernel are
    zero-cost views.
    """
    dims = _layer_dims(input_shape, n_latent)
    offs, total_rows = _row_offsets(dims)
    cols = max(128, _round_up(max(i for _, i in dims) + 1, 128))
    slab = jnp.zeros((_round_up(total_rows, 8), cols), jnp.float32)
    names = ("fc1", "fc2", "fc3", "fc4", "fc5", "fc6")
    for name, r0, (out_d, in_d) in zip(names, offs, dims):
        w, b = params[name]                               # w: [out, in], b: [out]
        slab = slab.at[r0:r0 + out_d, :in_d].set(w)
        slab = slab.at[r0:r0 + out_d, in_d].set(b)
    return slab


def _make_kernel(input_shape, n_latent):
    dims = _layer_dims(input_shape, n_latent)
    offs, _ = _row_offsets(dims)
    n_layers = len(dims)

    def kernel(p_ref, x_ref, o_ref):
        # x_ref: [F, TB] feature-major tile -> batch is on the 128-lane axis.
        h = x_ref[...]
        for li, (r0, (out_d, in_d)) in enumerate(zip(offs, dims)):
            w = p_ref[r0:r0 + out_d, 0:in_d]              # [out, in]  static slice
            b = p_ref[r0:r0 + out_d, in_d:in_d + 1]       # [out, 1]   lane-broadcast
            h = jnp.dot(w, h, preferred_element_type=jnp.float32) + b   # MXU + VPU
            if li < n_layers - 1:
                h = jnp.tanh(h)                           # EUP, lane-dense over TB
        o_ref[...] = h.astype(o_ref.dtype)

    return kernel


@functools.partial(jax.jit, static_argnames=("input_shape", "n_latent", "tb"))
def _vae_forward(x, params, *, input_shape, n_latent, tb):
    B, F = x.shape
    slab = pack_params(params, input_shape, n_latent)

    # Layout plumbing: put batch on the lane axis; pad batch to a tile multiple.
    xt = x.T                                              # [F, B]
    Bp = _round_up(max(B, tb), tb)
    if Bp != B:
        xt = jnp.pad(xt, ((0, 0), (0, Bp - B)))

    grid = (pl.cdiv(Bp, tb),)
    out_t = pl.pallas_call(
        _make_kernel(input_shape, n_latent),
        out_shape=jax.ShapeDtypeStruct((F, Bp), jnp.float32),
        grid=grid,
        in_specs=[
            # Whole parameter slab; constant block index -> one DMA, VMEM-resident.
            pl.BlockSpec(slab.shape, lambda i: (0, 0)),
            # Batch tile of the feature-major input, pipelined over the grid.
            pl.BlockSpec((F, tb), lambda i: (0, i)),
        ],
        out_specs=pl.BlockSpec((F, tb), lambda i: (0, i)),
        compiler_params=pltpu.CompilerParams(
            # Independent batch tiles -> v7x megacore shards grid steps.
            dimension_semantics=("parallel",),
        ),
    )(slab, xt)

    return out_t[:, :B].T                                 # back to [B, F]


def vae_forward(x, params, *, tb=512):
    """x: [B, input_shape] f32. params: PyTorch-layout dict of (W [out,in], b [out])."""
    assert tb % 128 == 0, "batch tile must be a multiple of 128 lanes"
    _, F = x.shape
    n_latent = params["fc3"][0].shape[0]
    # TODO(synk): optionally cast x / slab to bfloat16 (f32 accumulation kept) to
    # halve HBM traffic on v6e/v7x once accuracy is validated.
    return _vae_forward(x, params, input_shape=F, n_latent=n_latent, tb=tb)


def init_params(key, input_shape, n_latent):
    """PyTorch nn.Linear default init: U[-1/sqrt(in), 1/sqrt(in)] for W and b."""
    dims = _layer_dims(input_shape, n_latent)
    names = ("fc1", "fc2", "fc3", "fc4", "fc5", "fc6")
    params = {}
    keys = jax.random.split(key, 2 * len(dims))
    for i, (name, (out_d, in_d)) in enumerate(zip(names, dims)):
        bound = 1.0 / float(in_d) ** 0.5
        w = jax.random.uniform(keys[2 * i], (out_d, in_d), jnp.float32,
                               minval=-bound, maxval=bound)
        b = jax.random.uniform(keys[2 * i + 1], (out_d,), jnp.float32,
                               minval=-bound, maxval=bound)
        params[name] = (w, b)
    return params


def vae_forward_ref(x, params):
    h = x
    for name in ("fc1", "fc2", "fc3", "fc4", "fc5"):
        w, b = params[name]
        h = jnp.tanh(h @ w.T + b)
    w, b = params["fc6"]
    return h @ w.T + b


if __name__ == "__main__":
    B = 1000          # batch (deliberately not a tile multiple -> exercises padding)
    INPUT_SHAPE = 32  # VAE feature dim
    N_LATENT = 4
    TB = 256          # 2x128 lanes per tile -> 4-step pipelined, parallel grid

    key = jax.random.PRNGKey(0)
    kx, kp = jax.random.split(key)
    x = jax.random.normal(kx, (B, INPUT_SHAPE), jnp.float32)
    params = init_params(kp, INPUT_SHAPE, N_LATENT)

    out = jax.block_until_ready(vae_forward(x, params, tb=TB))

    ref = vae_forward_ref(x, params)
    assert out.shape == (B, INPUT_SHAPE), out.shape
    max_err = float(jnp.max(jnp.abs(out - ref)))
    assert jnp.allclose(out, ref, atol=1e-4, rtol=1e-4), max_err

    print("KERNEL_OK")
</pallas_src>

<mosaic_0001>
module attributes {stable_mosaic.version = 11 : i64} {
  func.func @kernel(%arg0: i32, %arg1: memref<72x128xf32, #tpu.memory_space<vmem>>, %arg2: memref<32x256xf32, #tpu.memory_space<vmem>>, %arg3: memref<32x256xf32, #tpu.memory_space<vmem>>) attributes {dimension_semantics = [#tpu.dimension_semantics<parallel>], iteration_bounds = array<i64: 4>, scalar_prefetch = 0 : i64, scratch_operands = 0 : i64, tpu.core_type = #tpu.core_type<tc>, window_params = [{pipeline_mode = #tpu.pipeline_mode<synchronous>, transform_indices = @transform_0, window_bounds = array<i64: 72, 128>}, {transform_indices = @transform_1, window_bounds = array<i64: 32, 256>}, {transform_indices = @transform_2, window_bounds = array<i64: 32, 256>}]} {
    %c0 = arith.constant 0 : index
    %c0_0 = arith.constant 0 : index
    %0 = vector.load %arg2[%c0, %c0_0] : memref<32x256xf32, #tpu.memory_space<vmem>>, vector<32x256xf32>
    %c0_1 = arith.constant 0 : index
    %c0_2 = arith.constant 0 : index
    %1 = vector.load %arg1[%c0_1, %c0_2] : memref<72x128xf32, #tpu.memory_space<vmem>>, vector<8x32xf32>
    %c0_3 = arith.constant 0 : index
    %c32 = arith.constant 32 : index
    %2 = vector.load %arg1[%c0_3, %c32] : memref<72x128xf32, #tpu.memory_space<vmem>>, vector<8x1xf32>
    %cst = arith.constant dense<0.000000e+00> : vector<8x256xf32>
    %3 = tpu.matmul %1, %0, %cst {dimension_numbers = #tpu.dot_dimension_numbers<[1], [0], [0], [1], [0, 0, 1, 1], [], []>} : vector<8x32xf32>, vector<32x256xf32>, vector<8x256xf32> -> vector<8x256xf32>
    %4 = vector.broadcast %2 : vector<8x1xf32> to vector<8x256xf32>
    %5 = arith.addf %3, %4 : vector<8x256xf32>
    %6 = math.tanh %5 : vector<8x256xf32>
    %c8 = arith.constant 8 : index
    %c0_4 = arith.constant 0 : index
    %7 = vector.load %arg1[%c8, %c0_4] : memref<72x128xf32, #tpu.memory_space<vmem>>, vector<8x8xf32>
    %c8_5 = arith.constant 8 : index
    %c8_6 = arith.constant 8 : index
    %8 = vector.load %arg1[%c8_5, %c8_6] : memref<72x128xf32, #tpu.memory_space<vmem>>, vector<8x1xf32>
    %cst_7 = arith.constant dense<0.000000e+00> : vector<8x256xf32>
    %9 = tpu.matmul %7, %6, %cst_7 {dimension_numbers = #tpu.dot_dimension_numbers<[1], [0], [0], [1], [0, 0, 1, 1], [], []>} : vector<8x8xf32>, vector<8x256xf32>, vector<8x256xf32> -> vector<8x256xf32>
    %10 = vector.broadcast %8 : vector<8x1xf32> to vector<8x256xf32>
    %11 = arith.addf %9, %10 : vector<8x256xf32>
    %12 = math.tanh %11 : vector<8x256xf32>
    %c16 = arith.constant 16 : index
    %c0_8 = arith.constant 0 : index
    %13 = vector.load %arg1[%c16, %c0_8] : memref<72x128xf32, #tpu.memory_space<vmem>>, vector<4x8xf32>
    %c16_9 = arith.constant 16 : index
    %c8_10 = arith.constant 8 : index
    %14 = vector.load %arg1[%c16_9, %c8_10] : memref<72x128xf32, #tpu.memory_space<vmem>>, vector<4x1xf32>
    %cst_11 = arith.constant dense<0.000000e+00> : vector<4x256xf32>
    %15 = tpu.matmul %13, %12, %cst_11 {dimension_numbers = #tpu.dot_dimension_numbers<[1], [0], [0], [1], [0, 0, 1, 1], [], []>} : vector<4x8xf32>, vector<8x256xf32>, vector<4x256xf32> -> vector<4x256xf32>
    %16 = vector.broadcast %14 : vector<4x1xf32> to vector<4x256xf32>
    %17 = arith.addf %15, %16 : vector<4x256xf32>
    %18 = math.tanh %17 : vector<4x256xf32>
    %c24 = arith.constant 24 : index
    %c0_12 = arith.constant 0 : index
    %19 = vector.load %arg1[%c24, %c0_12] : memref<72x128xf32, #tpu.memory_space<vmem>>, vector<8x4xf32>
    %c24_13 = arith.constant 24 : index
    %c4 = arith.constant 4 : index
    %20 = vector.load %arg1[%c24_13, %c4] : memref<72x128xf32, #tpu.memory_space<vmem>>, vector<8x1xf32>
    %cst_14 = arith.constant dense<0.000000e+00> : vector<8x256xf32>
    %21 = tpu.matmul %19, %18, %cst_14 {dimension_numbers = #tpu.dot_dimension_numbers<[1], [0], [0], [1], [0, 0, 1, 1], [], []>} : vector<8x4xf32>, vector<4x256xf32>, vector<8x256xf32> -> vector<8x256xf32>
    %22 = vector.broadcast %20 : vector<8x1xf32> to vector<8x256xf32>
    %23 = arith.addf %21, %22 : vector<8x256xf32>
    %24 = math.tanh %23 : vector<8x256xf32>
    %c32_15 = arith.constant 32 : index
    %c0_16 = arith.constant 0 : index
    %25 = vector.load %arg1[%c32_15, %c0_16] : memref<72x128xf32, #tpu.memory_space<vmem>>, vector<8x8xf32>
    %c32_17 = arith.constant 32 : index
    %c8_18 = arith.constant 8 : index
    %26 = vector.load %arg1[%c32_17, %c8_18] : memref<72x128xf32, #tpu.memory_space<vmem>>, vector<8x1xf32>
    %cst_19 = arith.constant dense<0.000000e+00> : vector<8x256xf32>
    %27 = tpu.matmul %25, %24, %cst_19 {dimension_numbers = #tpu.dot_dimension_numbers<[1], [0], [0], [1], [0, 0, 1, 1], [], []>} : vector<8x8xf32>, vector<8x256xf32>, vector<8x256xf32> -> vector<8x256xf32>
    %28 = vector.broadcast %26 : vector<8x1xf32> to vector<8x256xf32>
    %29 = arith.addf %27, %28 : vector<8x256xf32>
    %30 = math.tanh %29 : vector<8x256xf32>
    %c40 = arith.constant 40 : index
    %c0_20 = arith.constant 0 : index
    %31 = vector.load %arg1[%c40, %c0_20] : memref<72x128xf32, #tpu.memory_space<vmem>>, vector<32x8xf32>
    %c40_21 = arith.constant 40 : index
    %c8_22 = arith.constant 8 : index
    %32 = vector.load %arg1[%c40_21, %c8_22] : memref<72x128xf32, #tpu.memory_space<vmem>>, vector<32x1xf32>
    %cst_23 = arith.constant dense<0.000000e+00> : vector<32x256xf32>
    %33 = tpu.matmul %31, %30, %cst_23 {dimension_numbers = #tpu.dot_dimension_numbers<[1], [0], [0], [1], [0, 0, 1, 1], [], []>} : vector<32x8xf32>, vector<8x256xf32>, vector<32x256xf32> -> vector<32x256xf32>
    %34 = vector.broadcast %32 : vector<32x1xf32> to vector<32x256xf32>
    %35 = arith.addf %33, %34 : vector<32x256xf32>
    %c0_24 = arith.constant 0 : index
    %c0_25 = arith.constant 0 : index
    %36 = vector.load %arg3[%c0_24, %c0_25] : memref<32x256xf32, #tpu.memory_space<vmem>>, vector<32x256xf32>
    tpu.vector_store %arg3[%c0_24, %c0_25], %35 {strides = array<i32>} : memref<32x256xf32, #tpu.memory_space<vmem>>, vector<32x256xf32>,
    return
  }
  func.func @transform_0(%arg0: i32) -> (i32, i32) {
    %c0_i32 = arith.constant 0 : i32
    %c0_i32_0 = arith.constant 0 : i32
    %c0_i32_1 = arith.constant 0 : i32
    return %c0_i32, %c0_i32_0 : i32, i32
  }
  func.func @transform_1(%arg0: i32) -> (i32, i32) {
    %c0_i32 = arith.constant 0 : i32
    %c0_i32_0 = arith.constant 0 : i32
    return %c0_i32, %arg0 : i32, i32
  }
  func.func @transform_2(%arg0: i32) -> (i32, i32) {
    %c0_i32 = arith.constant 0 : i32
    %c0_i32_0 = arith.constant 0 : i32
    return %c0_i32, %arg0 : i32, i32
  }
}

</mosaic_0001>

<bundles_post_ra>
// kernel: _vae_forward.1
= control target key start
LH: loop header
LB: loop body
LE: loop exit
PB: predicated region body
PF: predicated region fallthrough
CT: control target
= control target key end

     0   :  { %s955_s9 = smov 0   ;;  %s957_s10 = smov 0   ;;  %s1088_s0 = inlined_call_operand.vmem [shape: f32[72,128], index: 0, kind: input, shape index: {}]   ;;  %s1089_s1 = inlined_call_operand.vmem [shape: f32[32,1024], index: 1, kind: input, shape index: {}]   ;;  %s1090_s2 = inlined_call_operand.vmem [shape: f32[32,1024], index: 2, kind: output, shape index: {}]  }
   0x1   :  { %s959_s11 = smov 0  }
   0x2 LB: > { %s823_s12 = sadd.s32 4294967295, %s934_s11   ;;  %s972_s13 = sadd.s32 1, %s934_s11   ;;  %s934_s11 = sphi %s959_s11, %s1094_s11   ;;  %s930_s10 = sphi %s957_s10, %s1093_s10   ;;  %s926_s9 = sphi %s955_s9, %s1092_s9  }
   0x3   : > { %s37_s14 = ssub.s32 %s934_s11, %s972_s13  ;;  %s40_s15 = sadd.s32 1, %s930_s10 }
   0x4   : > { %p38_p0 = scmp.eq.s32.totalorder %s37_s14, 0  ;;  %p47_p1 = scmp.ne.s32.totalorder %s930_s10, %s926_s9 }
   0x5   : > { %p48_p2 = scmp.eq.s32.totalorder %s934_s11, 0  ;;  %p77_p3 = scmp.eq.s32.totalorder %s823_s12, 3 }
   0x6   : > { %s983_s16 = scalar_select %p38_p0, %s930_s10, %s40_s15  }
   0x7   : > { %p49_p4 = por %p48_p2, %p47_p1  ;;  %p985_p5 = por %p77_p3, %p47_p1 }
   0x8   : > { %p826_p6 = scmp.ge.s32.totalorder %s934_s11, 4 }
   0xa   : > { %102 = sbr.rel (%p826_p6) target bundleno = 25 (0x19), region = 20 }
  0x11   : > { %105 = sbr.rel (!%p49_p4) target bundleno = 25 (0x19), region = 24  ;;  %s107_s18 = sand.u32 (%p49_p4), 1, %s930_s10  }
  0x12   : > { %s849_s19 = sshll.u32 (%p49_p4), %s934_s11, 4  ;;  %s827_s20 = sshll.u32 (%p49_p4), %s107_s18, 6 }
  0x13   : > { %s112_s23 = scalar_lea.vmem (%p49_p4), %s1089_s1, %s849_s19  ;;  %s109_s24 = scalar_lea.vmem (%p49_p4), [#allocation2], %s827_s20 }
  0x14   : > { %v125_v0 = vld [vmem:[%s112_s23] sm:$0xff] (%p49_p4)  ;;  %v127_v1 = vld [vmem:[%s112_s23 + $0x8] sm:$0xff] (%p49_p4) }
  0x15   : > { %v129_v2 = vld [vmem:[%s112_s23 + $0x40] sm:$0xff] (%p49_p4)  ;;  %126 = vst [vmem:[%s109_s24] sm:$0xff] (%p49_p4), %v125_v0  ;;  %128 = vst [vmem:[%s109_s24 + $0x8] sm:$0xff] (%p49_p4), %v127_v1  ;;  %v131_v3 = vld [vmem:[%s112_s23 + $0x48] sm:$0xff] (%p49_p4) }
  0x16   : > { %130 = vst [vmem:[%s109_s24 + $0x10] sm:$0xff] (%p49_p4), %v129_v2  ;;  %v133_v4 = vld [vmem:[%s112_s23 + $0x80] sm:$0xff] (%p49_p4)  ;;  %v135_v5 = vld [vmem:[%s112_s23 + $0x88] sm:$0xff] (%p49_p4)  ;;  %132 = vst [vmem:[%s109_s24 + $0x18] sm:$0xff] (%p49_p4), %v131_v3 }
  0x17   : > { %134 = vst [vmem:[%s109_s24 + $0x20] sm:$0xff] (%p49_p4), %v133_v4  ;;  %136 = vst [vmem:[%s109_s24 + $0x28] sm:$0xff] (%p49_p4), %v135_v5  ;;  %v137_v6 = vld [vmem:[%s112_s23 + $0xc0] sm:$0xff] (%p49_p4)  ;;  %v139_v7 = vld [vmem:[%s112_s23 + $0xc8] sm:$0xff] (%p49_p4) }
  0x18   : > { %138 = vst [vmem:[%s109_s24 + $0x30] sm:$0xff] %v137_v6  ;;  %140 = vst [vmem:[%s109_s24 + $0x38] sm:$0xff] %v139_v7 }
  0x19 PF: > { %p830_p7 = scmp.ge.s32.totalorder %s934_s11, 1  ;;  %p145_p8 = scmp.lt.s32.totalorder %s934_s11, 5 }
  0x1b   : > { %p146_p9 = pnand %p830_p7, %p145_p8 }
  0x1c   : > { %s152_s25 = sand.u32 (!%p146_p9), 1, %s926_s9   ;;  %v936_v8 = vmov (!%p146_p9), 0.0   ;;  %v182_v9 = vld [vmem:[%s1088_s0] sm:$0xff] (!%p146_p9)  ;;  %v937_v10 = vmov (!%p146_p9), 32   ;;  %vm188_vm0 = vcmask (!%p146_p9), 261120   ;;  %v264_v23 = vld [vmem:[%s1088_s0 + $0x8] sm:$0xff] (!%p146_p9) }
  0x1d   : > { %149 = sbr.rel (%p146_p9) target bundleno = 1418 (0x58a), region = 47  ;;  %s998_s26 = sshll.u32 (!%p146_p9), %s152_s25, 6  ;;  %255 = vmatprep.mubr.f32.mxu0 (!%p146_p9), %v936_v8  ;;  %887 = vset.pattern.permute.xlu0 (!%p146_p9), %v937_v10  ;;  %v938_v24 = vmov (!%p146_p9), 8   ;;  %v1013_v25 = vld [vmem:[%s1088_s0 + $0x28] sm:$0xff] (!%p146_p9)  ;;  %v1019_v26 = vld [vmem:[%s1088_s0 + $0x38] sm:$0xff] (!%p146_p9)  ;;  %vm270_vm1 = vcmask (!%p146_p9), 64512  }
  0x1e   : > { %185 = vperm.xlu0 (!%p146_p9), %887, %v182_v9   ;;  %507 = vmatprep.mubr.f32.mxu1 (!%p146_p9), %v936_v8  ;;  %s154_s29 = scalar_lea.vmem (!%p146_p9), [#allocation2], %s998_s26  ;;  %v346_v34 = vld [vmem:[%s1088_s0 + $0x10] sm:$0xf] (!%p146_p9)  ;;  %v427_v42 = vld [vmem:[%s1088_s0 + $0x18] sm:$0xff] (!%p146_p9)  ;;  %v939_v43 = vmov (!%p146_p9), 4   ;;  %vm436_vm2 = vcmask (!%p146_p9), 1043456  }
  0x1f   : > { %v175_v11 = vld [vmem:[%s154_s29 + $0x8] sm:$0xff] (!%p146_p9)  ;;  %v177_v12 = vld [vmem:[%s154_s29 + $0x18] sm:$0xff] (!%p146_p9)  ;;  %v174_v13 = vld [vmem:[%s154_s29] sm:$0xff] (!%p146_p9)  ;;  %889 = vset.pattern.permute.xlu1 (!%p146_p9), %v938_v24  ;;  %vm433_vm3 = vcmask (!%p146_p9), 31744   ;;  %s1053_s24 = scalar_lea.vmem (!%p146_p9), [#allocation3], %s998_s26 }
  0x20   : > { %v851_v14 = vpack.c.bf16 (!%p146_p9), %v177_v12, %v175_v11  ;;  %v176_v15 = vld [vmem:[%s154_s29 + $0x10] sm:$0xff] (!%p146_p9)  ;;  %v179_v16 = vld [vmem:[%s154_s29 + $0x28] sm:$0xff] (!%p146_p9)  ;;  %v181_v17 = vld [vmem:[%s154_s29 + $0x38] sm:$0xff] (!%p146_p9)  ;;  %349 = vperm.xlu1 (!%p146_p9), %889, %v346_v34  }
  0x21   : > { %v853_v18 = vpack.c.bf16 (!%p146_p9), %v176_v15, %v174_v13  ;;  %v855_v19 = vpack.c.bf16 (!%p146_p9), %v181_v17, %v179_v16  ;;  %v178_v20 = vld [vmem:[%s154_s29 + $0x20] sm:$0xff] (!%p146_p9)  ;;  %v180_v21 = vld [vmem:[%s154_s29 + $0x30] sm:$0xff] (!%p146_p9) }
  0x22   : > { %852 = vmatprep.subr.bf16.mxu0 (!%p146_p9), %v851_v14  ;;  %v857_v22 = vpack.c.bf16 (!%p146_p9), %v180_v21, %v178_v20  ;;  %888 = vset.pattern.permute.xlu0 (!%p146_p9), %v938_v24  ;;  %v516_v51 = vld [vmem:[%s1088_s0 + $0x20] sm:$0xff] (!%p146_p9)  ;;  %v598_v52 = vld [vmem:[%s1088_s0 + $0x30] sm:$0xff] (!%p146_p9) }
  0x23   : > { %854 = vmatpush1.bf16.msra.mxu0 (!%p146_p9), %v853_v18  ;;  %267 = vperm.xlu0 (!%p146_p9), %888, %v264_v23   ;;  %v600_v53 = vld [vmem:[%s1088_s0 + $0x40] sm:$0xff] (!%p146_p9) }
  0x24   : > { %856 = vmatprep.subr.bf16.mxu0 %v855_v19  ;;  %890 = vset.pattern.permute.xlu1 %v939_v43  ;;  %s850_s25 = sshll.u32 (%p985_p5), %s823_s12, 4 }
  0x25   : > { %430 = vperm.xlu1 %890, %v427_v42   ;;  %s735_s28 = scalar_lea.vmem (%p985_p5), %s1090_s2, %s850_s25 }
  0x27   : > { %858 = vmatpush1.bf16.msra.mxu0 %v857_v22  ;;  %603 = vperm.xlu0 %888, %v1013_v25  }
  0x29   : > { %891 = vset.pattern.permute.xlu1 %v938_v24 }
  0x2a   : > { %833 = vmatmul.mubr.msk.f32.vlgmr.msra.gmra.mrb[0].mxu0 %vm188_vm0, %v182_v9  ;;  %519 = vperm.xlu1 %891, %v516_v51  }
  0x2b   : > { %337 = vmatprep.mubr.f32.mxu0 %v936_v8  ;;  %613 = vperm.xlu0 %888, %v1019_v26  }
  0x2e   : > { %608 = vperm.xlu1 %891, %v598_v52  }
  0x32   : > { %618 = vperm.xlu1 %891, %v600_v53  }
  0x9d   : > { %v186_v27 = vpop.permute.xlu0 %185 }
  0x9f   : > { %v350_v44 = vpop.permute.xlu1 %349 }
  0xa2   : > { %v268_v35 = vpop.permute.xlu0 %267 }
  0xa4   : > { %v431_v54 = vpop.permute.xlu1 %430 }
  0xa6   : > { %v604_v4 = vpop.permute.xlu0 %603 }
  0xa9   : > { %v520_v61 = vpop.permute.xlu1 %519 }
  0xaa   : > { %v614_v14 = vpop.permute.xlu0 %613 }
  0xad   : > { %v609_v10 = vpop.permute.xlu1 %608 }
  0xb1   : > { %v619_v19 = vpop.permute.xlu1 %618 }
  0xfd   : > { %v257_v28 = vpop.f32.mrb[0].mxu0 }
  0xfe   : > { %v258_v29 = vadd.f32 %v257_v28, %v186_v27  ;;  %v259_v30 = vpop.f32.mrb[1].mxu0 }
  0xff   : > { %v260_v31 = vadd.f32 %v259_v30, %v186_v27 }
 0x101   : > { %892 = vtanh.f32 %v260_v31 }
 0x102   : > { %894 = vtanh.f32 %v258_v29 }
 0x10b   : > { %v893_v32 = vpop.eup %892 }
 0x10c   : > { %v895_v33 = vpop.eup %894  ;;  %273 = vmatprep.subr.mxu0 %v893_v32 }
 0x10d   : > { %274 = vmatpush1.msra.mxu0 %v895_v33 }
 0x10e   : > { %834 = vmatmul.mubr.msk.f32.vlgmr.msra.gmra.mrb[2].mxu0 %vm270_vm1, %v264_v23 }
 0x10f   : > { %418 = vmatprep.mubr.f32.mxu0 %v936_v8 }
 0x1e1   : > { %v339_v36 = vpop.f32.mrb[2].mxu0 }
 0x1e2   : > { %v340_v37 = vadd.f32 %v339_v36, %v268_v35  ;;  %v341_v38 = vpop.f32.mrb[3].mxu0 }
 0x1e3   : > { %v342_v39 = vadd.f32 %v341_v38, %v268_v35 }
 0x1e5   : > { %896 = vtanh.f32 %v342_v39 }
 0x1e6   : > { %898 = vtanh.f32 %v340_v37 }
 0x1ef   : > { %v897_v40 = vpop.eup %896 }
 0x1f0   : > { %v899_v41 = vpop.eup %898  ;;  %354 = vmatprep.subr.mxu0 %v897_v40 }
 0x1f1   : > { %355 = vmatpush1.msra.mxu0 %v899_v41 }
 0x1f2   : > { %835 = vmatmul.mubr.msk.f32.vlgmr.msra.gmra.mrb[4].mxu0 %vm270_vm1, %v346_v34 }
 0x1f3   : > { %588 = vmatprep.mubr.f32.mxu0 %v936_v8 }
 0x2c5   : > { %v420_v45 = vpop.f32.mrb[4].mxu0 }
 0x2c6   : > { %v421_v46 = vadd.f32 %v420_v45, %v350_v44  ;;  %v422_v47 = vpop.f32.mrb[5].mxu0 }
 0x2c7   : > { %v423_v48 = vadd.f32 %v422_v47, %v350_v44 }
 0x2c9   : > { %900 = vtanh.f32 %v423_v48 }
 0x2ca   : > { %902 = vtanh.f32 %v421_v46 }
 0x2d3   : > { %v901_v49 = vpop.eup %900 }
 0x2d4   : > { %v903_v50 = vpop.eup %902  ;;  %836 = vmatprep.subr.msk.mxu1 %vm436_vm2, %v901_v49 }
 0x2d5   : > { %837 = vmatpush1.msk.msra.mxu1 %vm436_vm2, %v903_v50 }
 0x2d6   : > { %838 = vmatmul.mubr.msk.f32.vlgmr.msra.gmra.mrb[0].mxu1 %vm433_vm3, %v427_v42 }
 0x2d7   : > { %693 = vmatprep.mubr.f32.mxu1 %v936_v8 }
 0x3a9   : > { %v509_v55 = vpop.f32.mrb[0].mxu1 }
 0x3aa   : > { %v510_v56 = vadd.f32 %v509_v55, %v431_v54  ;;  %v511_v57 = vpop.f32.mrb[1].mxu1 }
 0x3ab   : > { %v512_v58 = vadd.f32 %v511_v57, %v431_v54 }
 0x3ad   : > { %904 = vtanh.f32 %v512_v58 }
 0x3ae   : > { %906 = vtanh.f32 %v510_v56 }
 0x3b7   : > { %v905_v59 = vpop.eup %904 }
 0x3b8   : > { %v907_v60 = vpop.eup %906  ;;  %524 = vmatprep.subr.mxu0 %v905_v59 }
 0x3b9   : > { %525 = vmatpush1.msra.mxu0 %v907_v60 }
 0x3ba   : > { %839 = vmatmul.mubr.msk.f32.vlgmr.msra.gmra.mrb[6].mxu0 %vm270_vm1, %v516_v51 }
 0x48d   : > { %v590_v62 = vpop.f32.mrb[6].mxu0 }
 0x48e   : > { %v591_v63 = vadd.f32 %v590_v62, %v520_v61  ;;  %v592_v0 = vpop.f32.mrb[7].mxu0 }
 0x48f   : > { %v593_v1 = vadd.f32 %v592_v0, %v520_v61 }
 0x491   : > { %908 = vtanh.f32 %v593_v1 }
 0x492   : > { %910 = vtanh.f32 %v591_v63 }
 0x49b   : > { %v909_v2 = vpop.eup %908 }
 0x49c   : > { %v911_v3 = vpop.eup %910  ;;  %629 = vmatprep.subr.mxu1 %v909_v2 }
 0x49d   : > { %630 = vmatpush1.msra.mxu1 %v911_v3 }
 0x49e   : > { %840 = vmatmul.mubr.msk.f32.vlgmr.msra.gmra.mrb[2].mxu1 %vm270_vm1, %v1013_v25 }
 0x49f   : > { %699 = vmatprep.mubr.f32.mxu1 %v936_v8 }
 0x4a2   : > { %841 = vmatmul.mubr.msk.f32.gmra.mrb[4].mxu1 %vm270_vm1, %v598_v52 }
 0x4a3   : > { %705 = vmatprep.mubr.f32.mxu1 %v936_v8 }
 0x4a6   : > { %842 = vmatmul.mubr.msk.f32.gmra.mrb[6].mxu1 %vm270_vm1, %v1019_v26 }
 0x4a7   : > { %711 = vmatprep.mubr.f32.mxu1 %v936_v8 }
 0x4aa   : > { %843 = vmatmul.mubr.msk.f32.gmra.mrb[8].mxu1 %vm270_vm1, %v600_v53 }
 0x571   : > { %v695_v5 = vpop.f32.mrb[2].mxu1 }
 0x572   : > { %v696_v6 = vadd.f32 %v695_v5, %v604_v4  ;;  %v697_v7 = vpop.f32.mrb[3].mxu1 }
 0x573   : > { %v698_v9 = vadd.f32 %v697_v7, %v604_v4 }
 0x574   : > { %718 = vst [vmem:[%s1053_s24] sm:$0xff] %v696_v6 }
 0x575   : > { %719 = vst [vmem:[%s1053_s24 + $0x8] sm:$0xff] %v698_v9  ;;  %v701_v11 = vpop.f32.mrb[4].mxu1 }
 0x576   : > { %v702_v8 = vadd.f32 %v701_v11, %v609_v10  ;;  %v703_v12 = vpop.f32.mrb[5].mxu1 }
 0x577   : > { %v704_v13 = vadd.f32 %v703_v12, %v609_v10 }
 0x578   : > { %720 = vst [vmem:[%s1053_s24 + $0x10] sm:$0xff] %v702_v8 }
 0x579   : > { %721 = vst [vmem:[%s1053_s24 + $0x18] sm:$0xff] %v704_v13  ;;  %v707_v15 = vpop.f32.mrb[6].mxu1 }
 0x57a   : > { %v708_v16 = vadd.f32 %v707_v15, %v614_v14  ;;  %v709_v17 = vpop.f32.mrb[7].mxu1 }
 0x57b   : > { %v710_v18 = vadd.f32 %v709_v17, %v614_v14  ;;  %732 = sbr.rel (!%p985_p5) target bundleno = 1418 (0x58a), region = 55  ;;  %v748_v24 = vld [vmem:[%s1053_s24] sm:$0xff] (%p985_p5) }
 0x57c   : > { %722 = vst [vmem:[%s1053_s24 + $0x20] sm:$0xff] %v708_v16  ;;  %v750_v25 = vld [vmem:[%s1053_s24 + $0x8] sm:$0xff] (%p985_p5)  ;;  %749 = vst [vmem:[%s735_s28] sm:$0xff] (%p985_p5), %v748_v24 }
 0x57d   : > { %723 = vst [vmem:[%s1053_s24 + $0x28] sm:$0xff] %v710_v18  ;;  %v713_v20 = vpop.f32.mrb[8].mxu1  ;;  %751 = vst [vmem:[%s735_s28 + $0x8] sm:$0xff] (%p985_p5), %v750_v25 }
 0x57e   : > { %v714_v21 = vadd.f32 %v713_v20, %v619_v19  ;;  %v715_v22 = vpop.f32.mrb[9].mxu1 }
 0x57f   : > { %v716_v23 = vadd.f32 %v715_v22, %v619_v19  ;;  %v752_v26 = vld [vmem:[%s1053_s24 + $0x10] sm:$0xff] (%p985_p5) }
 0x580   : > { %724 = vst [vmem:[%s1053_s24 + $0x30] sm:$0xff] %v714_v21  ;;  %v754_v27 = vld [vmem:[%s1053_s24 + $0x18] sm:$0xff] (%p985_p5)  ;;  %753 = vst [vmem:[%s735_s28 + $0x40] sm:$0xff] (%p985_p5), %v752_v26 }
 0x581   : > { %725 = vst [vmem:[%s1053_s24 + $0x38] sm:$0xff] %v716_v23  ;;  %755 = vst [vmem:[%s735_s28 + $0x48] sm:$0xff] (%p985_p5), %v754_v27 }
 0x583   : > { %v756_v28 = vld [vmem:[%s1053_s24 + $0x20] sm:$0xff] }
 0x584   : > { %v758_v29 = vld [vmem:[%s1053_s24 + $0x28] sm:$0xff]  ;;  %757 = vst [vmem:[%s735_s28 + $0x80] sm:$0xff] %v756_v28 }
 0x585   : > { %759 = vst [vmem:[%s735_s28 + $0x88] sm:$0xff] %v758_v29 }
 0x587   : > { %v760_v30 = vld [vmem:[%s1053_s24 + $0x30] sm:$0xff] }
 0x588   : > { %v762_v31 = vld [vmem:[%s1053_s24 + $0x38] sm:$0xff]  ;;  %761 = vst [vmem:[%s735_s28 + $0xc0] sm:$0xff] %v760_v30 }
 0x589   : > { %763 = vst [vmem:[%s735_s28 + $0xc8] sm:$0xff] %v762_v31 }
 0x58a PF: > { %p9_p10 = scmp.ge.s32.totalorder %s972_s13, 6   ;;  %s1092_s9 = smov %s930_s10 }
 0x58b   : > { %s1093_s10 = smov %s983_s16  ;;  %s1094_s11 = smov %s972_s13 }
 0x58c   :  { %11 = sbr.rel (!%p9_p10) target bundleno = 2 (0x2), region = 109 }

</bundles_post_ra>
